<compile_context>
chip_gen: v5e
topology: v5e:2x2
jax: 0.10.0
libtpu: 0.0.40
codegen_flags: <defaults>
</compile_context>

<pallas_src>
import jax
import jax.numpy as jnp
from jax.experimental import pallas as pl
from jax.experimental.pallas import tpu as pltpu


def _round_up(a, b):
    return ((a + b - 1) // b) * b


def _choose_row_tile(R, N, C):
    """Pick TR = rows of 128 lanes (per channel) processed per grid step."""
    # Cap: one (1, C, TR, 128) f32 block <= ~4 MiB, so double-buffered in+out
    # stays ~16 MiB of VMEM -- fits comfortably on v5e/v6e/v7x.
    max_block_elems = 1 << 20                                  # 1M f32 = 4 MiB
    tr_cap = max(8, ((max_block_elems // (C * 128)) // 8) * 8)
    # Floor: keep >= ~0.75 MiB of HBM traffic per step so per-step pipeline
    # overhead stays small.
    tr_floor = 256
    tr = min(R, tr_cap)
    # Give v7x's two TensorCores enough grid points to split across.
    min_steps = 8
    if R > tr_floor and N * pl.cdiv(R, tr) < min_steps:
        want_tiles = pl.cdiv(min_steps, N)
        tr = max(tr_floor, _round_up(pl.cdiv(R, want_tiles), 8))
    tr = min(tr, R)
    if tr != R:
        # Block dim must be a multiple of 8 unless it equals the full dim.
        tr = max(8, (tr // 8) * 8)
    return tr


def _normalize_kernel(scale_ref, bias_ref, x_ref, o_ref):
    # scale_ref / bias_ref: SMEM (C,) f32 scalars (scale = 1/std, bias = -mean/std)
    # x_ref / o_ref:        VMEM (1, C, TR, 128) blocks (sublane/lane aligned)
    C = x_ref.shape[1]
    for c in range(C):  # static C (=3) -> unrolled at trace time
        o_ref[0, c] = (x_ref[0, c] * scale_ref[c] + bias_ref[c]).astype(o_ref.dtype)


def normalize(x, mean, std, *, min_pallas_bytes=2 * 1024 * 1024,
              vmem_limit_bytes=40 * 1024 * 1024):
    """x: (N, C, H, W); mean/std: (C,). Returns (x - mean) / std (broadcast)."""
    N, C, H, W = x.shape
    hw = H * W

    # Affine reformulation:  (x - m)/s == x*(1/s) + (-m/s)  (one vmul + vadd).
    scale = (1.0 / std).astype(jnp.float32)
    bias = (-mean / std).astype(jnp.float32)

    # Fallbacks: tiny tensors (pallas_call launch + pipeline prologue dominate)
    # or a spatial size that cannot be viewed lane-dense without a pad copy.
    # TODO(synk): a Pallas path for hw % 128 != 0 would need a padded copy; the
    # fused XLA elementwise op is already HBM-bound optimal in that case.
    if x.size * x.dtype.itemsize < min_pallas_bytes or hw % 128 != 0:
        return (x - mean.reshape(1, C, 1, 1)) / std.reshape(1, C, 1, 1)

    R = hw // 128
    x4 = x.reshape(N, C, R, 128)          # free view of contiguous NCHW
    tr = _choose_row_tile(R, N, C)
    num_r = pl.cdiv(R, tr)                # Pallas masks the partial last tile

    out = pl.pallas_call(
        _normalize_kernel,
        out_shape=jax.ShapeDtypeStruct((N, C, R, 128), x.dtype),
        grid=(N, num_r),
        in_specs=[
            pl.BlockSpec(memory_space=pltpu.MemorySpace.SMEM),   # scale (C,)
            pl.BlockSpec(memory_space=pltpu.MemorySpace.SMEM),   # bias  (C,)
            pl.BlockSpec((1, C, tr, 128), lambda n, r: (n, 0, r, 0)),
        ],
        out_specs=pl.BlockSpec((1, C, tr, 128), lambda n, r: (n, 0, r, 0)),
        compiler_params=pltpu.CompilerParams(
            dimension_semantics=("parallel", "parallel"),
            vmem_limit_bytes=vmem_limit_bytes,
        ),
    )(scale, bias, x4)

    return out.reshape(N, C, H, W)


if __name__ == "__main__":
    key = jax.random.PRNGKey(0)

    # Module buffers (3-channel mean/std, as the forward's reshape(1,3,1,1) implies).
    mean = jnp.array([0.485, 0.456, 0.406], dtype=jnp.float32)
    std = jnp.array([0.229, 0.224, 0.225], dtype=jnp.float32)

    # Small NCHW input consistent with the forward pass (C must be 3).
    x = jax.random.normal(key, (2, 3, 16, 16), dtype=jnp.float32)

    # Reference (mirrors the PyTorch broadcast exactly).
    ref = (x - mean.reshape(1, 3, 1, 1)) / std.reshape(1, 3, 1, 1)

    # Default path: this tiny input takes the fused-XLA fallback.
    out_small = jax.block_until_ready(normalize(x, mean, std))
    assert out_small.shape == ref.shape and out_small.dtype == ref.dtype
    assert jnp.allclose(out_small, ref, rtol=1e-5, atol=1e-6)

    # Force the Pallas path so the kernel itself is compiled and run.
    out_pallas = jax.block_until_ready(normalize(x, mean, std, min_pallas_bytes=0))
    assert out_pallas.shape == ref.shape and out_pallas.dtype == ref.dtype
    # Tolerance covers the (x*(1/std) - mean/std) reformulation (~1-2 ulp).
    assert jnp.allclose(out_pallas, ref, rtol=1e-5, atol=1e-6)

    print("KERNEL_OK")
</pallas_src>

<mosaic_0001>
module attributes {stable_mosaic.version = 11 : i64} {
  func.func @_normalize_kernel(%arg0: i32, %arg1: i32, %arg2: memref<3xf32, #tpu.memory_space<smem>>, %arg3: memref<3xf32, #tpu.memory_space<smem>>, %arg4: memref<1x3x2x128xf32, #tpu.memory_space<vmem>>, %arg5: memref<1x3x2x128xf32, #tpu.memory_space<vmem>>) attributes {dimension_semantics = [#tpu.dimension_semantics<parallel>, #tpu.dimension_semantics<parallel>], iteration_bounds = array<i64: 2, 1>, scalar_prefetch = 0 : i64, scratch_operands = 0 : i64, tpu.core_type = #tpu.core_type<tc>, window_params = [{transform_indices = @transform_0, window_bounds = array<i64: 3>}, {transform_indices = @transform_1, window_bounds = array<i64: 3>}, {transform_indices = @transform_2, window_bounds = array<i64: 1, 3, 2, 128>}, {transform_indices = @transform_3, window_bounds = array<i64: 1, 3, 2, 128>}]} {
    %c0 = arith.constant 0 : index
    %c0_0 = arith.constant 0 : index
    %c0_1 = arith.constant 0 : index
    %c0_2 = arith.constant 0 : index
    %0 = vector.load %arg4[%c0, %c0_0, %c0_1, %c0_2] : memref<1x3x2x128xf32, #tpu.memory_space<vmem>>, vector<1x1x2x128xf32>
    %1 = vector.shape_cast %0 : vector<1x1x2x128xf32> to vector<2x128xf32>
    %c0_3 = arith.constant 0 : index
    %2 = memref.load %arg2[%c0_3] : memref<3xf32, #tpu.memory_space<smem>>
    %3 = vector.broadcast %2 : f32 to vector<2x128xf32>
    %4 = arith.mulf %1, %3 : vector<2x128xf32>
    %c0_4 = arith.constant 0 : index
    %5 = memref.load %arg3[%c0_4] : memref<3xf32, #tpu.memory_space<smem>>
    %6 = vector.broadcast %5 : f32 to vector<2x128xf32>
    %7 = arith.addf %4, %6 : vector<2x128xf32>
    %c0_5 = arith.constant 0 : index
    %c0_6 = arith.constant 0 : index
    %c0_7 = arith.constant 0 : index
    %c0_8 = arith.constant 0 : index
    %8 = vector.load %arg5[%c0_5, %c0_6, %c0_7, %c0_8] : memref<1x3x2x128xf32, #tpu.memory_space<vmem>>, vector<1x1x2x128xf32>
    %9 = vector.shape_cast %8 : vector<1x1x2x128xf32> to vector<2x128xf32>
    %10 = vector.shape_cast %7 : vector<2x128xf32> to vector<1x1x2x128xf32>
    tpu.vector_store %arg5[%c0_5, %c0_6, %c0_7, %c0_8], %10 {strides = array<i32>} : memref<1x3x2x128xf32, #tpu.memory_space<vmem>>, vector<1x1x2x128xf32>,
    %c0_9 = arith.constant 0 : index
    %c1 = arith.constant 1 : index
    %c0_10 = arith.constant 0 : index
    %c0_11 = arith.constant 0 : index
    %11 = vector.load %arg4[%c0_9, %c1, %c0_10, %c0_11] : memref<1x3x2x128xf32, #tpu.memory_space<vmem>>, vector<1x1x2x128xf32>
    %12 = vector.shape_cast %11 : vector<1x1x2x128xf32> to vector<2x128xf32>
    %c1_12 = arith.constant 1 : index
    %13 = memref.load %arg2[%c1_12] : memref<3xf32, #tpu.memory_space<smem>>
    %14 = vector.broadcast %13 : f32 to vector<2x128xf32>
    %15 = arith.mulf %12, %14 : vector<2x128xf32>
    %c1_13 = arith.constant 1 : index
    %16 = memref.load %arg3[%c1_13] : memref<3xf32, #tpu.memory_space<smem>>
    %17 = vector.broadcast %16 : f32 to vector<2x128xf32>
    %18 = arith.addf %15, %17 : vector<2x128xf32>
    %c0_14 = arith.constant 0 : index
    %c1_15 = arith.constant 1 : index
    %c0_16 = arith.constant 0 : index
    %c0_17 = arith.constant 0 : index
    %19 = vector.load %arg5[%c0_14, %c1_15, %c0_16, %c0_17] : memref<1x3x2x128xf32, #tpu.memory_space<vmem>>, vector<1x1x2x128xf32>
    %20 = vector.shape_cast %19 : vector<1x1x2x128xf32> to vector<2x128xf32>
    %21 = vector.shape_cast %18 : vector<2x128xf32> to vector<1x1x2x128xf32>
    tpu.vector_store %arg5[%c0_14, %c1_15, %c0_16, %c0_17], %21 {strides = array<i32>} : memref<1x3x2x128xf32, #tpu.memory_space<vmem>>, vector<1x1x2x128xf32>,
    %c0_18 = arith.constant 0 : index
    %c2 = arith.constant 2 : index
    %c0_19 = arith.constant 0 : index
    %c0_20 = arith.constant 0 : index
    %22 = vector.load %arg4[%c0_18, %c2, %c0_19, %c0_20] : memref<1x3x2x128xf32, #tpu.memory_space<vmem>>, vector<1x1x2x128xf32>
    %23 = vector.shape_cast %22 : vector<1x1x2x128xf32> to vector<2x128xf32>
    %c2_21 = arith.constant 2 : index
    %24 = memref.load %arg2[%c2_21] : memref<3xf32, #tpu.memory_space<smem>>
    %25 = vector.broadcast %24 : f32 to vector<2x128xf32>
    %26 = arith.mulf %23, %25 : vector<2x128xf32>
    %c2_22 = arith.constant 2 : index
    %27 = memref.load %arg3[%c2_22] : memref<3xf32, #tpu.memory_space<smem>>
    %28 = vector.broadcast %27 : f32 to vector<2x128xf32>
    %29 = arith.addf %26, %28 : vector<2x128xf32>
    %c0_23 = arith.constant 0 : index
    %c2_24 = arith.constant 2 : index
    %c0_25 = arith.constant 0 : index
    %c0_26 = arith.constant 0 : index
    %30 = vector.load %arg5[%c0_23, %c2_24, %c0_25, %c0_26] : memref<1x3x2x128xf32, #tpu.memory_space<vmem>>, vector<1x1x2x128xf32>
    %31 = vector.shape_cast %30 : vector<1x1x2x128xf32> to vector<2x128xf32>
    %32 = vector.shape_cast %29 : vector<2x128xf32> to vector<1x1x2x128xf32>
    tpu.vector_store %arg5[%c0_23, %c2_24, %c0_25, %c0_26], %32 {strides = array<i32>} : memref<1x3x2x128xf32, #tpu.memory_space<vmem>>, vector<1x1x2x128xf32>,
    return
  }
  func.func @transform_0(%arg0: i32, %arg1: i32) -> i32 {
    %c0_i32 = arith.constant 0 : i32
    %c0_i32_0 = arith.constant 0 : i32
    return %c0_i32 : i32
  }
  func.func @transform_1(%arg0: i32, %arg1: i32) -> i32 {
    %c0_i32 = arith.constant 0 : i32
    %c0_i32_0 = arith.constant 0 : i32
    return %c0_i32 : i32
  }
  func.func @transform_2(%arg0: i32, %arg1: i32) -> (i32, i32, i32, i32) {
    %c0_i32 = arith.constant 0 : i32
    %c0_i32_0 = arith.constant 0 : i32
    %c0_i32_1 = arith.constant 0 : i32
    return %arg0, %c0_i32, %arg1, %c0_i32_0 : i32, i32, i32, i32
  }
  func.func @transform_3(%arg0: i32, %arg1: i32) -> (i32, i32, i32, i32) {
    %c0_i32 = arith.constant 0 : i32
    %c0_i32_0 = arith.constant 0 : i32
    %c0_i32_1 = arith.constant 0 : i32
    return %arg0, %c0_i32, %arg1, %c0_i32_0 : i32, i32, i32, i32
  }
}

</mosaic_0001>

<bundles_post_ra>
// kernel: tpu_custom_call.1
= control target key start
LH: loop header
LB: loop body
LE: loop exit
PB: predicated region body
PF: predicated region fallthrough
CT: control target
= control target key end

     0   :  { %s835_s0 = inlined_call_operand.hbm [shape: f32[3], index: 0, kind: input, shape index: {}]   ;;  %s836_s1 = inlined_call_operand.hbm [shape: f32[3], index: 1, kind: input, shape index: {}]   ;;  %s837_s2 = inlined_call_operand.hbm [shape: f32[2,3,2,128], index: 2, kind: input, shape index: {}]   ;;  %s838_s3 = inlined_call_operand.hbm [shape: f32[2,3,2,128], index: 3, kind: output, shape index: {}]  }
   0x1   :  { %839 = sst [smem:[#allocation14_spill]] %s835_s0 }
   0x2   :  { %8 = vsyncpa [#allocation5], 0 }
   0x3   :  { %9 = vsyncpa [#allocation7], 0 }
   0x4   :  { %10 = vsyncpa [#allocation3], 0 }
   0x5   :  { %12 = vsyncpa [#allocation3 + $0x1], 0 }
   0x6   :  { %13 = vsyncpa [#allocation4], 0 }
   0x7   :  { %15 = vsyncpa [#allocation4 + $0x1], 0  ;;  %s677_s12 = smov 0   ;;  %s679_s13 = smov 0  }
   0x8   :  { %s681_s14 = smov 0   ;;  %s683_s15 = smov 0  }
   0x9   :  { %s685_s16 = smov 0   ;;  %s687_s17 = smov 0  }
   0xa LB: > { %s387_s18 = sadd.s32 4294967295, %s649_s17   ;;  %s388_s19 = sadd.s32 4294967294, %s649_s17   ;;  %s649_s17 = sphi %s687_s17, %s21_s17   ;;  %s645_s16 = sphi %s685_s16, %s852_s16   ;;  %s641_s15 = sphi %s683_s15, %s851_s15   ;;  %s637_s14 = sphi %s681_s14, %s850_s14   ;;  %s633_s13 = sphi %s679_s13, %s849_s13   ;;  %s629_s12 = sphi %s677_s12, %s848_s12  }
   0xb   : > { %s84_s20 = sadd.s32 1, %s637_s14  ;;  %p91_p0 = scmp.ne.s32.totalorder %s637_s14, %s633_s13 }
   0xc   : > { %p92_p1 = scmp.eq.s32.totalorder %s649_s17, 0  ;;  %p97_p2 = scmp.ne.s32.totalorder %s633_s13, %s629_s12 }
   0xd   : > { %p715_p3 = scmp.eq.s32.totalorder %s387_s18, 0  ;;  %p123_p4 = scmp.eq.s32.totalorder %s387_s18, 1 }
   0xe   : > { %p719_p5 = por %p92_p1, %p91_p0  ;;  %p129_p6 = scmp.eq.s32.totalorder %s388_s19, 1 }
   0xf   : > { %p725_p7 = por %p715_p3, %p97_p2  ;;  %p729_p8 = por %p123_p4, %p91_p0 }
  0x10   : > { %p733_p9 = por %p129_p6, %p97_p2  ;;  %p389_p10 = scmp.ge.s32.totalorder %s649_s17, 1 }
  0x11   : > { %p136_p11 = scmp.lt.s32.totalorder %s649_s17, 3  ;;  %s845_s0 = sld [smem:[#allocation14_spill]] }
  0x12   : > { %p392_p13 = scmp.ge.s32.totalorder %s649_s17, 2  ;;  %p441_p0 = scmp.lt.s32.totalorder %s649_s17, 2 }
  0x13   : > { %p742_p12 = pnand %p389_p10, %p136_p11  ;;  %s158_s5 = sshll.u32 %s836_s1, 4  ;;  %s159_s5 = int_to_ptr.hbm [resolvable:$true] %s158_s5 }
  0x14   : > { %p755_p2 = pnand %p441_p0, %p719_p5  ;;  %s651_s7 = smov [#allocation2]  }
  0x15   : > { %p424_p1 = pneg %p742_p12  ;;  %s652_s8 = smov [#allocation6]  }
  0x16   : > { %s33_s9 = sadd.s32 1, %s645_s16  ;;  %s169_s10 = sand.u32 1, %s637_s14  }
  0x17   : > { %s148_s28 = sshll.u32 %s845_s0, 4  ;;  %p425_p4 = pnand %p424_p1, %p715_p3  ;;  %s149_s28 = int_to_ptr.hbm [resolvable:$true] %s148_s28 }
  0x18   : > { %p35_p6 = scmp.ge.s32.totalorder %s33_s9, 2  ;;  %s408_s11 = smul.u32 6, %s169_s10 }
  0x19   : > { %427 = dma.hbm_to_smem (!%p425_p4), %s149_s28, 16, %s651_s7, [#allocation5]  }
  0x1a   : > { %430 = dma.hbm_to_smem (!%p425_p4), %s159_s5, 16, %s652_s8, [#allocation7]  }
  0x1b   : > { %s854_s9 = smov (%p35_p6, %s33_s9), 0  ;;  %s409_s18 = smul.u32 6, %s645_s16 }
  0x1c   : > { %s79_s19 = ssub.s32 %s645_s16, %s854_s9  ;;  %s173_s22 = scalar_lea.vmem [#allocation8], %s408_s11 }
  0x1d   : > { %s182_s26 = sshll.u32 %s173_s22, 4  ;;  %p82_p5 = scmp.eq.s32.totalorder %s79_s19, 0  ;;  %s183_s26 = int_to_ptr.vmem [resolvable:$true] %s182_s26 }
  0x1e   : > { %s179_s28 = scalar_lea.hbm %s837_s2, %s409_s18  ;;  %s170_s7 = scalar_lea.sflag [#allocation3], %s169_s10 }
  0x1f   : > { %s180_s4 = sshll.u32 %s179_s28, 4  ;;  %s653_s8 = smov 32   ;;  %s181_s4 = int_to_ptr.hbm [resolvable:$true] %s180_s4 }
  0x20   : > { %s774_s5 = scalar_select %p82_p5, %s637_s14, %s84_s20  }
  0x21   : > { %s654_s0 = smov 2   ;;  %194 = sbr.rel (%p742_p12) target bundleno = 67 (0x43), region = 32 }
  0x22   : > { %434 = dma.hbm_to_vmem [thread:$0]  (!%p755_p2), %s181_s4, 96, %s183_s26, %s170_s7, %s653_s8, %s653_s8, %s654_s0  }
  0x26   : > { %612 = dma.done.wait (%p715_p3), [#allocation5], 16  }
  0x27   : > { %614 = vsyncadd (%p715_p3), [#allocation5], 4294967280 }
  0x28   : > { %616 = dma.done.wait (%p715_p3), [#allocation7], 16  }
  0x29   : > { %618 = vsyncadd (%p715_p3), [#allocation7], 4294967280  ;;  %s789_s20 = sand.u32 1, %s633_s13  }
  0x2a   : > { %s410_s0 = smul.u32 6, %s789_s20  ;;  %s207_s29 = scalar_lea.sflag [#allocation3], %s789_s20 }
  0x2c   : > { %s210_s6 = scalar_lea.vmem [#allocation8], %s410_s0 }
  0x2d   : > { %620 = dma.done.wait (%p725_p7), %s207_s29, 96  }
  0x2e   : > { %622 = vsyncadd (%p725_p7), %s207_s29, 4294967200 }
  0x2f   : > { %216 = sfence }
  0x30   : > { %s236_s10 = sld [smem:[#allocation2]]  ;;  %v235_v0 = vld [vmem:[%s210_s6] sm:$0x3]  ;;  %s411_s22 = smul.u32 6, %s641_s15  ;;  %v397_v2 = vld [vmem:[%s210_s6 + $0x2] sm:$0x3] }
  0x31   : > { %s239_s11 = sld [smem:[#allocation6]]  ;;  %s234_s23 = scalar_lea.vmem [#allocation9], %s410_s0  ;;  %v401_v6 = vld [vmem:[%s210_s6 + $0x4] sm:$0x3] }
  0x32   : > { %s398_s21 = sld [smem:[#allocation2 + $0x1]]  ;;  %s276_s28 = scalar_lea.hbm %s838_s3, %s411_s22 }
  0x33   : > { %s399_s18 = sld [smem:[#allocation6 + $0x1]]  ;;  %s277_s4 = sshll.u32 %s234_s23, 4  ;;  %s278_s4 = int_to_ptr.vmem [resolvable:$true] %s277_s4 }
  0x34   : > { %s402_s19 = sld [smem:[#allocation2 + $0x2]]  ;;  %s279_s15 = sshll.u32 %s276_s28, 4  ;;  %s280_s15 = int_to_ptr.hbm [resolvable:$true] %s279_s15 }
  0x35   : > { %s403_s26 = sld [smem:[#allocation6 + $0x2]]  ;;  %s264_s7 = scalar_lea.sflag [#allocation4], %s789_s20 }
  0x36   : > { %v237_v1 = vstv %s236_s10  ;;  %s573_s8 = sshra.s32 %s280_s15, 4  ;;  %s579_s10 = scalar_lea.hbm %s838_s3, 12  ;;  %s574_s8 = int_to_ptr.hbm [resolvable:$true] %s573_s8 }
  0x37   : > { %v238_v3 = vmul.f32 %v237_v1, %v235_v0  ;;  %v240_v4 = vstv %s239_s11  ;;  %s575_s0 = scalar_lea.hbm %s574_s8, 6  ;;  %p580_p11 = scmp.lt.s32.totalorder %s574_s8, %s838_s3 }
  0x38   : > { %v246_v5 = vstv %s398_s21  ;;  %p576_p3 = scmp.ne.s32.totalorder %s574_s8, %s575_s0  ;;  %p581_p12 = scmp.lt.s32.totalorder %s579_s10, %s575_s0 }
  0x39   : > { %v241_v7 = vadd.f32 %v240_v4, %v238_v3  ;;  %v247_v8 = vmul.f32 %v397_v2, %v246_v5  ;;  %v249_v9 = vstv %s399_s18 }
  0x3a   : > { %v256_v10 = vstv %s402_s19  ;;  %p577_p7 = pnand %p576_p3, %p729_p8  ;;  %p582_p0 = por %p581_p12, %p580_p11 }
  0x3b   : > { %242 = vst [vmem:[%s234_s23] sm:$0x3] %v241_v7  ;;  %v250_v11 = vadd.f32 %v249_v9, %v247_v8  ;;  %v257_v12 = vmul.f32 %v401_v6, %v256_v10  ;;  %v259_v13 = vstv %s403_s26 }
  0x3c   : > { %p578_p10 = pneg %p577_p7 }
  0x3d   : > { %400 = vst [vmem:[%s234_s23 + $0x2] sm:$0x3] %v250_v11  ;;  %v260_v14 = vadd.f32 %v259_v13, %v257_v12 }
  0x3e   : > { %p583_p1 = pnand %p582_p0, %p578_p10 }
  0x3f   : > { %404 = vst [vmem:[%s234_s23 + $0x4] sm:$0x3] %v260_v14 }
  0x40   : > { %586 = shalt.err (!%p583_p1)
}
  0x41   : > { %s655_s20 = smov 32   ;;  %s656_s18 = smov 2  }
  0x42   : > { %422 = dma.vmem_to_hbm [thread:$0]  (%p729_p8), %s278_s4, 96, %s280_s15, %s264_s7, %s655_s20, %s655_s20, %s656_s18  }
  0x43 PF: > { %s294_s19 = sand.u32 1, %s629_s12   ;;  %p436_p2 = pnand %p392_p13, %p733_p9 }
  0x44   : > { %s295_s22 = scalar_lea.sflag [#allocation4], %s294_s19 }
  0x45   : > { %p437_p4 = pneg %p436_p2 }
  0x47   : > { %624 = dma.done.wait (%p437_p4), %s295_s22, 96  }
  0x48   : > { %626 = vsyncadd (%p437_p4), %s295_s22, 4294967200  ;;  %s21_s17 = sadd.s32 1, %s649_s17   ;;  %s848_s12 = smov %s633_s13 }
  0x49   : > { %p18_p6 = scmp.ge.s32.totalorder %s21_s17, 4   ;;  %s849_s13 = smov %s637_s14 }
  0x4a   : > { %s850_s14 = smov %s774_s5  ;;  %s851_s15 = smov %s645_s16 }
  0x4b   : > { %s852_s16 = smov %s854_s9  ;;  %20 = sbr.rel (!%p18_p6) target bundleno = 10 (0xa), region = 90 }
  0x50   :  { %301 = vsyncpa [#allocation3], 1 }
  0x51   :  { %303 = vsyncpa [#allocation3 + $0x1], 1 }
  0x52   :  { %304 = vsyncpa [#allocation4], 1 }
  0x53   :  { %306 = vsyncpa [#allocation4 + $0x1], 1 }
  0x54   :  { %307 = vsyncpa [#allocation5], 1 }
  0x55   :  { %309 = vsyncpa [#allocation5 + $0x1], 1 }
  0x56   :  { %310 = vsyncpa [#allocation7], 1 }

</bundles_post_ra>
